<compile_context>
chip_gen: v7x
topology: tpu7x:2x2x1
jax: 0.10.0
libtpu: 0.0.40
codegen_flags: <defaults>
</compile_context>

<pallas_src>
import functools

import jax
import jax.numpy as jnp
from jax.experimental import pallas as pl
from jax.experimental.pallas import tpu as pltpu

EMBED_DIM = 100   # fixed by the module: nn.Embedding(output_size, 100)
LANE = 128        # vreg lane width
SUBLANE = 8       # vreg sublane count (f32)
_NEG = -1.0e30    # "minus infinity" baked into the padded vocab lanes of the output bias


def _round_up(x, m):
    return (x + m - 1) // m * m


def _decoder_step_kernel(x_ref, h0_ref, wih_ref, whh_ref, bi_ref, bh_ref,
                         wout_ref, bout_ref, logp_ref, h_ref, *, hidden_size, compact):
    """One GRU decoder step; grid axis 0 iterates the decode steps.

    x_ref   : (1, Bp, Kp)  bf16  streamed per step: [relu(emb) | ctx | zero-pad]
    h0_ref  : (Bp, Hp)     f32   initial hidden state (read at step 0 only)
    wih_ref : (Kp, GW)     bf16  packed GRU W_ih^T (VMEM-resident for all steps)
    whh_ref : (Hp, GW)     bf16  packed GRU W_hh^T (resident)
    bi_ref  : (1, GW)      f32   r/z lanes: b_ih + b_hh ; n lanes: b_ih      (resident)
    bh_ref  : (1, GW)      f32   n lanes: b_hh ; elsewhere 0                 (resident)
    wout_ref: (Hp, Vp)     bf16  output Linear weight^T                      (resident)
    bout_ref: (1, Vp)      f32   output bias; pad lanes pre-set to -1e30     (resident)
    logp_ref: (1, Bp, Vp)  f32   [out] per-step log-probs (streamed)
    h_ref   : (Bp, Hp)     f32   [out] grid-resident hidden-state carry / final hidden
    """
    t = pl.program_id(0)

    @pl.when(t == 0)
    def _():
        h_ref[...] = h0_ref[...]

    h = h_ref[...]                 # (Bp, Hp) f32, carried across steps in VMEM
    x = x_ref[0]                   # (Bp, Kp) bf16

    gi = jnp.dot(x, wih_ref[...], preferred_element_type=jnp.float32) + bi_ref[...]
    gh = jnp.dot(h.astype(jnp.bfloat16), whh_ref[...],
                 preferred_element_type=jnp.float32) + bh_ref[...]

    H = hidden_size
    if compact:
        # All three gates live in one 128-lane slab: lanes [0:H)=r, [H:2H)=z, [2H:3H)=n.
        r = jax.nn.sigmoid(gi[:, 0:H] + gh[:, 0:H])
        z = jax.nn.sigmoid(gi[:, H:2 * H] + gh[:, H:2 * H])
        n = jnp.tanh(gi[:, 2 * H:3 * H] + r * gh[:, 2 * H:3 * H])
        # Keep the (zero) pad lanes of the stored hidden state intact.
        h_new = jnp.concatenate([(1.0 - z) * n + z * h[:, 0:H], h[:, H:]], axis=-1)
    else:
        # One 128-lane-aligned slab per gate: whole-vreg slices, no cross-lane traffic.
        HP = h_ref.shape[1]
        r = jax.nn.sigmoid(gi[:, 0 * HP:1 * HP] + gh[:, 0 * HP:1 * HP])
        z = jax.nn.sigmoid(gi[:, 1 * HP:2 * HP] + gh[:, 1 * HP:2 * HP])
        n = jnp.tanh(gi[:, 2 * HP:3 * HP] + r * gh[:, 2 * HP:3 * HP])
        h_new = (1.0 - z) * n + z * h
    h_ref[...] = h_new

    # Linear + LogSoftmax.  Padded vocab lanes have zero weight columns and a -1e30 bias baked
    # in at pack time, so exp(pad - m) underflows to 0 with no in-kernel mask.
    logits = jnp.dot(h_new.astype(jnp.bfloat16), wout_ref[...],
                     preferred_element_type=jnp.float32) + bout_ref[...]
    m = jnp.max(logits, axis=-1, keepdims=True)
    lse = jnp.log(jnp.sum(jnp.exp(logits - m), axis=-1, keepdims=True)) + m
    logp_ref[0] = logits - lse


def init_decoder_params(key, hidden_size, output_size):
    """Deterministic parameter init mirroring the PyTorch module's shapes (f32 master copy)."""
    H, V = hidden_size, output_size
    I = H + EMBED_DIM
    ks = jax.random.split(key, 7)
    u = lambda k, shape, s: jax.random.uniform(k, shape, jnp.float32, -s, s)
    gs = 1.0 / jnp.sqrt(H)
    ls = 1.0 / jnp.sqrt(H)
    return {
        "embedding": jax.random.normal(ks[0], (V, EMBED_DIM), jnp.float32),
        "w_ih": u(ks[1], (3 * H, I), gs),     # GRU weight_ih_l0   (3H, 100+H)
        "w_hh": u(ks[2], (3 * H, H), gs),     # GRU weight_hh_l0   (3H, H)
        "b_ih": u(ks[3], (3 * H,), gs),
        "b_hh": u(ks[4], (3 * H,), gs),
        "w_out": u(ks[5], (V, H), ls),        # Linear weight      (V, H)
        "b_out": u(ks[6], (V,), ls),
    }


def pack_decoder_params(params):
    """Pre-transpose, pad, gate-block, bias-fold and bf16-cast the weights.  Done ONCE."""
    H = params["w_hh"].shape[1]
    V = params["w_out"].shape[0]
    K = EMBED_DIM + H
    H_pad = _round_up(H, LANE)
    V_pad = _round_up(V, LANE)
    K_pad = _round_up(K, LANE)

    compact = (3 * H <= LANE)
    if compact:                       # all 3 gates in one 128-lane slab
        GW = LANE
        offs = (0, H, 2 * H)
    else:                             # one 128-lane-aligned slab per gate
        GW = 3 * H_pad
        offs = (0, H_pad, 2 * H_pad)

    w_ih, w_hh = params["w_ih"], params["w_hh"]
    b_ih, b_hh = params["b_ih"], params["b_hh"]

    wih_p = jnp.zeros((K_pad, GW), jnp.float32)
    whh_p = jnp.zeros((H_pad, GW), jnp.float32)
    bi_p = jnp.zeros((1, GW), jnp.float32)
    bh_p = jnp.zeros((1, GW), jnp.float32)
    for g, o in enumerate(offs):      # PyTorch GRU gate order: [reset | update | new]
        wih_p = wih_p.at[:K, o:o + H].set(w_ih[g * H:(g + 1) * H, :].T)
        whh_p = whh_p.at[:H, o:o + H].set(w_hh[g * H:(g + 1) * H, :].T)
        if g < 2:   # r, z: pre-sum b_ih + b_hh at pack time
            bi_p = bi_p.at[0, o:o + H].set(b_ih[g * H:(g + 1) * H] + b_hh[g * H:(g + 1) * H])
        else:       # n: b_ih adds to gi; b_hh must stay inside r*(W_hn h + b_hn)
            bi_p = bi_p.at[0, o:o + H].set(b_ih[g * H:(g + 1) * H])
            bh_p = bh_p.at[0, o:o + H].set(b_hh[g * H:(g + 1) * H])

    wout_p = jnp.zeros((H_pad, V_pad), jnp.float32).at[:H, :V].set(params["w_out"].T)
    # Vocab mask baked into the bias: pad lanes = -1e30 (weights there are zero).
    bout_p = jnp.full((1, V_pad), _NEG, jnp.float32).at[0, :V].set(params["b_out"])

    return {
        "embedding": params["embedding"],
        "wih": wih_p.astype(jnp.bfloat16), "whh": whh_p.astype(jnp.bfloat16),
        "bi": bi_p, "bh": bh_p,
        "wout": wout_p.astype(jnp.bfloat16), "bout": bout_p,
        "H": H, "V": V, "K": K,
        "H_pad": H_pad, "V_pad": V_pad, "K_pad": K_pad,
        "GW": GW, "compact": compact,
    }


def decoder_rnn_decode(packed, tokens, hidden, context, batch_size):
    """Run T teacher-forced decoder steps in ONE fused pallas_call.

    tokens : int32 (T, B) token indices (one column per step)
    hidden : f32 viewable as (1, B, H) initial hidden state
    context: f32 (1, B, H) context (fixed across steps, as in the module's forward signature)
    returns: (log_probs (T, B, V), final hidden (1, B, H))
    """
    H, V, K = packed["H"], packed["V"], packed["K"]
    H_pad, V_pad, K_pad, GW = packed["H_pad"], packed["V_pad"], packed["K_pad"], packed["GW"]
    T = tokens.shape[0]
    B = batch_size
    B_pad = _round_up(B, SUBLANE)

    # Glue, once per decode (not per step): embedding gather + ReLU + concat with context,
    # zero-padded and cast to bf16 so the kernel's MXU LHS tiles are ready to use.
    emb = jnp.maximum(packed["embedding"][tokens], 0.0)          # (T, B, 100), ReLU folded here
    ctx = jnp.broadcast_to(context[0], (T, B, H))
    xcat = jnp.zeros((T, B_pad, K_pad), jnp.bfloat16)
    xcat = xcat.at[:, :B, :EMBED_DIM].set(emb.astype(jnp.bfloat16))
    xcat = xcat.at[:, :B, EMBED_DIM:K].set(ctx.astype(jnp.bfloat16))

    h0 = hidden.reshape(1, B, H)[0]
    h0_p = jnp.zeros((B_pad, H_pad), jnp.float32).at[:B, :H].set(h0)

    kernel = functools.partial(_decoder_step_kernel,
                               hidden_size=H, compact=packed["compact"])

    def resident(shape):  # same block every step -> DMA'd once, stays VMEM-resident
        return pl.BlockSpec(shape, lambda t, _n=len(shape): (0,) * _n)

    logp_p, hlast_p = pl.pallas_call(
        kernel,
        grid=(T,),
        in_specs=[
            pl.BlockSpec((1, B_pad, K_pad), lambda t: (t, 0, 0)),   # x: streamed per step
            resident((B_pad, H_pad)),                               # h0
            resident((K_pad, GW)),                                  # wih (resident bf16)
            resident((H_pad, GW)),                                  # whh
            resident((1, GW)),                                      # bi
            resident((1, GW)),                                      # bh
            resident((H_pad, V_pad)),                               # wout
            resident((1, V_pad)),                                   # bout
        ],
        out_specs=(
            pl.BlockSpec((1, B_pad, V_pad), lambda t: (t, 0, 0)),   # per-step log-probs
            resident((B_pad, H_pad)),                               # hidden carry / final h
        ),
        out_shape=(
            jax.ShapeDtypeStruct((T, B_pad, V_pad), jnp.float32),
            jax.ShapeDtypeStruct((B_pad, H_pad), jnp.float32),
        ),
        input_output_aliases={1: 1},   # reuse the initial-hidden HBM buffer for final hidden
        compiler_params=pltpu.CompilerParams(dimension_semantics=("arbitrary",)),
    )(xcat, h0_p, packed["wih"], packed["whh"], packed["bi"], packed["bh"],
      packed["wout"], packed["bout"])

    return logp_p[:, :B, :V], hlast_p[:B, :H][None, :, :]


def decoder_rnn_forward(packed, input_ids, hidden, context, batch_size):
    """Matches DecoderRNN.forward(input, hidden, context, batch_size): one step (T=1)."""
    logp, h_new = decoder_rnn_decode(packed, input_ids, hidden, context, batch_size)
    return logp[0], h_new


def _reference_forward(params, input_ids, hidden, context, batch_size):
    """Pure-JAX f32 reference mirroring the PyTorch forward."""
    H = params["w_hh"].shape[1]
    B = batch_size
    emb = jnp.maximum(params["embedding"][input_ids[0]], 0.0)
    h = hidden.reshape(1, B, H)[0]
    x = jnp.concatenate([emb, context[0]], axis=1)
    gi = x @ params["w_ih"].T + params["b_ih"]
    gh = h @ params["w_hh"].T + params["b_hh"]
    r = jax.nn.sigmoid(gi[:, :H] + gh[:, :H])
    z = jax.nn.sigmoid(gi[:, H:2 * H] + gh[:, H:2 * H])
    n = jnp.tanh(gi[:, 2 * H:] + r * gh[:, 2 * H:])
    h_new = (1.0 - z) * n + z * h
    logits = h_new @ params["w_out"].T + params["b_out"]
    return jax.nn.log_softmax(logits, axis=1), h_new[None]


def _reference_decode(params, tokens, hidden, context, batch_size):
    logps, h = [], hidden
    for t in range(tokens.shape[0]):
        logp, h = _reference_forward(params, tokens[t:t + 1], h, context, batch_size)
        logps.append(logp)
    return jnp.stack(logps), h


if __name__ == "__main__":
    key = jax.random.PRNGKey(0)

    def check(name, got, want, atol):
        assert got.shape == want.shape, (name, got.shape, want.shape)
        err = float(jnp.max(jnp.abs(got - want)))
        assert err < atol, (name, err)

    # Config 1: H=32 (compact gate slab, 3H <= 128).  Config 2: H=80 (per-gate slab path,
    # odd batch / non-multiple-of-128 dims).  bf16 MXU operands -> loosened tolerances.
    for (H, V, B, T) in [(32, 64, 4, 5), (80, 200, 3, 3)]:
        key, k_par, k_in, k_h, k_c = jax.random.split(key, 5)
        params = init_decoder_params(k_par, H, V)
        packed = pack_decoder_params(params)

        input_ids = jax.random.randint(k_in, (1, B), 0, V, jnp.int32)
        hidden = jax.random.normal(k_h, (1, B, H), jnp.float32)
        context = jax.random.normal(k_c, (1, B, H), jnp.float32)

        # Single step: matches DecoderRNN.forward(input, hidden, context, batch_size).
        logp, h1 = decoder_rnn_forward(packed, input_ids, hidden, context, B)
        jax.block_until_ready((logp, h1))
        ref_lp, ref_h = _reference_forward(params, input_ids, hidden, context, B)
        check("logp", logp, ref_lp, 1e-1)
        check("h1", h1, ref_h, 1e-1)

        # Fused multi-step decode: weights stay VMEM-resident for all T steps in one launch.
        tokens = jax.random.randint(k_in, (T, B), 0, V, jnp.int32)
        logps, hT = decoder_rnn_decode(packed, tokens, hidden, context, B)
        jax.block_until_ready((logps, hT))
        ref_lps, ref_hT = _reference_decode(params, tokens, hidden, context, B)
        check("logps", logps, ref_lps, 2e-1)
        check("hT", hT, ref_hT, 2e-1)

    print("KERNEL_OK")
</pallas_src>

<mosaic_0001>
module attributes {stable_mosaic.version = 11 : i64} {
  func.func @_decoder_step_kernel(%arg0: i32, %arg1: memref<1x8x256xbf16, #tpu.memory_space<vmem>>, %arg2: memref<8x128xf32, #tpu.memory_space<vmem>>, %arg3: memref<256x128xbf16, #tpu.memory_space<vmem>>, %arg4: memref<128x128xbf16, #tpu.memory_space<vmem>>, %arg5: memref<1x128xf32, #tpu.memory_space<vmem>>, %arg6: memref<1x128xf32, #tpu.memory_space<vmem>>, %arg7: memref<128x128xbf16, #tpu.memory_space<vmem>>, %arg8: memref<1x128xf32, #tpu.memory_space<vmem>>, %arg9: memref<1x8x128xf32, #tpu.memory_space<vmem>>, %arg10: memref<8x128xf32, #tpu.memory_space<vmem>>) attributes {dimension_semantics = [#tpu.dimension_semantics<arbitrary>], iteration_bounds = array<i64: 1>, scalar_prefetch = 0 : i64, scratch_operands = 0 : i64, tpu.core_type = #tpu.core_type<tc>, window_params = [{transform_indices = @transform_0, window_bounds = array<i64: 1, 8, 256>}, {pipeline_mode = #tpu.pipeline_mode<synchronous>, transform_indices = @transform_1, window_bounds = array<i64: 8, 128>}, {pipeline_mode = #tpu.pipeline_mode<synchronous>, transform_indices = @transform_2, window_bounds = array<i64: 256, 128>}, {pipeline_mode = #tpu.pipeline_mode<synchronous>, transform_indices = @transform_3, window_bounds = array<i64: 128, 128>}, {pipeline_mode = #tpu.pipeline_mode<synchronous>, transform_indices = @transform_4, window_bounds = array<i64: 1, 128>}, {pipeline_mode = #tpu.pipeline_mode<synchronous>, transform_indices = @transform_5, window_bounds = array<i64: 1, 128>}, {pipeline_mode = #tpu.pipeline_mode<synchronous>, transform_indices = @transform_6, window_bounds = array<i64: 128, 128>}, {pipeline_mode = #tpu.pipeline_mode<synchronous>, transform_indices = @transform_7, window_bounds = array<i64: 1, 128>}, {transform_indices = @transform_8, window_bounds = array<i64: 1, 8, 128>}, {pipeline_mode = #tpu.pipeline_mode<synchronous>, transform_indices = @transform_9, window_bounds = array<i64: 8, 128>}]} {
    %c0_i32 = arith.constant 0 : i32
    %0 = arith.cmpi eq, %arg0, %c0_i32 : i32
    %1 = arith.extui %0 : i1 to i32
    %c0_i32_0 = arith.constant 0 : i32
    %2 = arith.cmpi ne, %1, %c0_i32_0 : i32
    scf.if %2 {
      %c0_29 = arith.constant 0 : index
      %c0_30 = arith.constant 0 : index
      %67 = vector.load %arg2[%c0_29, %c0_30] : memref<8x128xf32, #tpu.memory_space<vmem>>, vector<8x128xf32>
      %c0_31 = arith.constant 0 : index
      %c0_32 = arith.constant 0 : index
      %68 = vector.load %arg10[%c0_31, %c0_32] : memref<8x128xf32, #tpu.memory_space<vmem>>, vector<8x128xf32>
      tpu.vector_store %arg10[%c0_31, %c0_32], %67 {strides = array<i32>} : memref<8x128xf32, #tpu.memory_space<vmem>>, vector<8x128xf32>,
    } else {
    }
    %c0 = arith.constant 0 : index
    %c0_1 = arith.constant 0 : index
    %3 = vector.load %arg10[%c0, %c0_1] : memref<8x128xf32, #tpu.memory_space<vmem>>, vector<8x128xf32>
    %c0_2 = arith.constant 0 : index
    %c0_3 = arith.constant 0 : index
    %c0_4 = arith.constant 0 : index
    %4 = vector.load %arg1[%c0_2, %c0_3, %c0_4] : memref<1x8x256xbf16, #tpu.memory_space<vmem>>, vector<1x8x256xbf16>
    %5 = vector.shape_cast %4 : vector<1x8x256xbf16> to vector<8x256xbf16>
    %c0_5 = arith.constant 0 : index
    %c0_6 = arith.constant 0 : index
    %6 = vector.load %arg3[%c0_5, %c0_6] : memref<256x128xbf16, #tpu.memory_space<vmem>>, vector<256x128xbf16>
    %cst = arith.constant dense<0.000000e+00> : vector<8x128xf32>
    %7 = tpu.matmul %5, %6, %cst {dimension_numbers = #tpu.dot_dimension_numbers<[1], [0], [0], [1], [0, 0, 1, 1], [], []>} : vector<8x256xbf16>, vector<256x128xbf16>, vector<8x128xf32> -> vector<8x128xf32>
    %c0_7 = arith.constant 0 : index
    %c0_8 = arith.constant 0 : index
    %8 = vector.load %arg5[%c0_7, %c0_8] : memref<1x128xf32, #tpu.memory_space<vmem>>, vector<1x128xf32>
    %9 = vector.broadcast %8 : vector<1x128xf32> to vector<8x128xf32>
    %10 = arith.addf %7, %9 : vector<8x128xf32>
    %11 = arith.truncf %3 : vector<8x128xf32> to vector<8x128xbf16>
    %c0_9 = arith.constant 0 : index
    %c0_10 = arith.constant 0 : index
    %12 = vector.load %arg4[%c0_9, %c0_10] : memref<128x128xbf16, #tpu.memory_space<vmem>>, vector<128x128xbf16>
    %cst_11 = arith.constant dense<0.000000e+00> : vector<8x128xf32>
    %13 = tpu.matmul %11, %12, %cst_11 {dimension_numbers = #tpu.dot_dimension_numbers<[1], [0], [0], [1], [0, 0, 1, 1], [], []>} : vector<8x128xbf16>, vector<128x128xbf16>, vector<8x128xf32> -> vector<8x128xf32>
    %c0_12 = arith.constant 0 : index
    %c0_13 = arith.constant 0 : index
    %14 = vector.load %arg6[%c0_12, %c0_13] : memref<1x128xf32, #tpu.memory_space<vmem>>, vector<1x128xf32>
    %15 = vector.broadcast %14 : vector<1x128xf32> to vector<8x128xf32>
    %16 = arith.addf %13, %15 : vector<8x128xf32>
    %17 = vector.extract_strided_slice %10 {offsets = [0, 0], sizes = [8, 32], strides = [1, 1]} : vector<8x128xf32> to vector<8x32xf32>
    %18 = vector.extract_strided_slice %16 {offsets = [0, 0], sizes = [8, 32], strides = [1, 1]} : vector<8x128xf32> to vector<8x32xf32>
    %19 = arith.addf %17, %18 : vector<8x32xf32>
    %20 = arith.negf %19 : vector<8x32xf32>
    %21 = math.exp %20 : vector<8x32xf32>
    %cst_14 = arith.constant 1.000000e+00 : f32
    %22 = vector.broadcast %cst_14 : f32 to vector<8x32xf32>
    %23 = arith.addf %22, %21 : vector<8x32xf32>
    %24 = arith.divf %22, %23 : vector<8x32xf32>
    %25 = vector.extract_strided_slice %10 {offsets = [0, 32], sizes = [8, 32], strides = [1, 1]} : vector<8x128xf32> to vector<8x32xf32>
    %26 = vector.extract_strided_slice %16 {offsets = [0, 32], sizes = [8, 32], strides = [1, 1]} : vector<8x128xf32> to vector<8x32xf32>
    %27 = arith.addf %25, %26 : vector<8x32xf32>
    %28 = arith.negf %27 : vector<8x32xf32>
    %29 = math.exp %28 : vector<8x32xf32>
    %cst_15 = arith.constant 1.000000e+00 : f32
    %30 = vector.broadcast %cst_15 : f32 to vector<8x32xf32>
    %31 = arith.addf %30, %29 : vector<8x32xf32>
    %32 = arith.divf %30, %31 : vector<8x32xf32>
    %33 = vector.extract_strided_slice %10 {offsets = [0, 64], sizes = [8, 32], strides = [1, 1]} : vector<8x128xf32> to vector<8x32xf32>
    %34 = vector.extract_strided_slice %16 {offsets = [0, 64], sizes = [8, 32], strides = [1, 1]} : vector<8x128xf32> to vector<8x32xf32>
    %35 = arith.mulf %24, %34 : vector<8x32xf32>
    %36 = arith.addf %33, %35 : vector<8x32xf32>
    %37 = math.tanh %36 : vector<8x32xf32>
    %cst_16 = arith.constant 1.000000e+00 : f32
    %38 = vector.broadcast %cst_16 : f32 to vector<8x32xf32>
    %39 = arith.subf %38, %32 : vector<8x32xf32>
    %40 = arith.mulf %39, %37 : vector<8x32xf32>
    %41 = vector.extract_strided_slice %3 {offsets = [0, 0], sizes = [8, 32], strides = [1, 1]} : vector<8x128xf32> to vector<8x32xf32>
    %42 = arith.mulf %32, %41 : vector<8x32xf32>
    %43 = arith.addf %40, %42 : vector<8x32xf32>
    %44 = vector.extract_strided_slice %3 {offsets = [0, 32], sizes = [8, 96], strides = [1, 1]} : vector<8x128xf32> to vector<8x96xf32>
    %45 = tpu.concatenate %43, %44 in 1 : vector<8x32xf32>, vector<8x96xf32> -> vector<8x128xf32>
    %c0_17 = arith.constant 0 : index
    %c0_18 = arith.constant 0 : index
    %46 = vector.load %arg10[%c0_17, %c0_18] : memref<8x128xf32, #tpu.memory_space<vmem>>, vector<8x128xf32>
    tpu.vector_store %arg10[%c0_17, %c0_18], %45 {strides = array<i32>} : memref<8x128xf32, #tpu.memory_space<vmem>>, vector<8x128xf32>,
    %47 = arith.truncf %45 : vector<8x128xf32> to vector<8x128xbf16>
    %c0_19 = arith.constant 0 : index
    %c0_20 = arith.constant 0 : index
    %48 = vector.load %arg7[%c0_19, %c0_20] : memref<128x128xbf16, #tpu.memory_space<vmem>>, vector<128x128xbf16>
    %cst_21 = arith.constant dense<0.000000e+00> : vector<8x128xf32>
    %49 = tpu.matmul %47, %48, %cst_21 {dimension_numbers = #tpu.dot_dimension_numbers<[1], [0], [0], [1], [0, 0, 1, 1], [], []>} : vector<8x128xbf16>, vector<128x128xbf16>, vector<8x128xf32> -> vector<8x128xf32>
    %c0_22 = arith.constant 0 : index
    %c0_23 = arith.constant 0 : index
    %50 = vector.load %arg8[%c0_22, %c0_23] : memref<1x128xf32, #tpu.memory_space<vmem>>, vector<1x128xf32>
    %51 = vector.broadcast %50 : vector<1x128xf32> to vector<8x128xf32>
    %52 = arith.addf %49, %51 : vector<8x128xf32>
    %cst_24 = arith.constant dense<0xFF800000> : vector<8xf32>
    %53 = vector.multi_reduction <maximumf>, %52, %cst_24 [1] : vector<8x128xf32> to vector<8xf32>
    %54 = vector.shape_cast %53 : vector<8xf32> to vector<8x1xf32>
    %55 = vector.broadcast %54 : vector<8x1xf32> to vector<8x128xf32>
    %56 = arith.subf %52, %55 : vector<8x128xf32>
    %57 = math.exp %56 : vector<8x128xf32>
    %cst_25 = arith.constant dense<0.000000e+00> : vector<8xf32>
    %58 = vector.multi_reduction <add>, %57, %cst_25 [1] : vector<8x128xf32> to vector<8xf32>
    %59 = vector.shape_cast %58 : vector<8xf32> to vector<8x1xf32>
    %60 = math.log %59 : vector<8x1xf32>
    %61 = arith.addf %60, %54 : vector<8x1xf32>
    %62 = vector.broadcast %61 : vector<8x1xf32> to vector<8x128xf32>
    %63 = arith.subf %52, %62 : vector<8x128xf32>
    %c0_26 = arith.constant 0 : index
    %c0_27 = arith.constant 0 : index
    %c0_28 = arith.constant 0 : index
    %64 = vector.load %arg9[%c0_26, %c0_27, %c0_28] : memref<1x8x128xf32, #tpu.memory_space<vmem>>, vector<1x8x128xf32>
    %65 = vector.shape_cast %64 : vector<1x8x128xf32> to vector<8x128xf32>
    %66 = vector.shape_cast %63 : vector<8x128xf32> to vector<1x8x128xf32>
    tpu.vector_store %arg9[%c0_26, %c0_27, %c0_28], %66 {strides = array<i32>} : memref<1x8x128xf32, #tpu.memory_space<vmem>>, vector<1x8x128xf32>,
    return
  }
  func.func @transform_0(%arg0: i32) -> (i32, i32, i32) {
    %c0_i32 = arith.constant 0 : i32
    %c0_i32_0 = arith.constant 0 : i32
    %c0_i32_1 = arith.constant 0 : i32
    return %arg0, %c0_i32, %c0_i32_0 : i32, i32, i32
  }
  func.func @transform_1(%arg0: i32) -> (i32, i32) {
    %c0_i32 = arith.constant 0 : i32
    %c0_i32_0 = arith.constant 0 : i32
    %c0_i32_1 = arith.constant 0 : i32
    return %c0_i32, %c0_i32_0 : i32, i32
  }
  func.func @transform_2(%arg0: i32) -> (i32, i32) {
    %c0_i32 = arith.constant 0 : i32
    %c0_i32_0 = arith.constant 0 : i32
    %c0_i32_1 = arith.constant 0 : i32
    return %c0_i32, %c0_i32_0 : i32, i32
  }
  func.func @transform_3(%arg0: i32) -> (i32, i32) {
    %c0_i32 = arith.constant 0 : i32
    %c0_i32_0 = arith.constant 0 : i32
    %c0_i32_1 = arith.constant 0 : i32
    return %c0_i32, %c0_i32_0 : i32, i32
  }
  func.func @transform_4(%arg0: i32) -> (i32, i32) {
    %c0_i32 = arith.constant 0 : i32
    %c0_i32_0 = arith.constant 0 : i32
    %c0_i32_1 = arith.constant 0 : i32
    return %c0_i32, %c0_i32_0 : i32, i32
  }
  func.func @transform_5(%arg0: i32) -> (i32, i32) {
    %c0_i32 = arith.constant 0 : i32
    %c0_i32_0 = arith.constant 0 : i32
    %c0_i32_1 = arith.constant 0 : i32
    return %c0_i32, %c0_i32_0 : i32, i32
  }
  func.func @transform_6(%arg0: i32) -> (i32, i32) {
    %c0_i32 = arith.constant 0 : i32
    %c0_i32_0 = arith.constant 0 : i32
    %c0_i32_1 = arith.constant 0 : i32
    return %c0_i32, %c0_i32_0 : i32, i32
  }
  func.func @transform_7(%arg0: i32) -> (i32, i32) {
    %c0_i32 = arith.constant 0 : i32
    %c0_i32_0 = arith.constant 0 : i32
    %c0_i32_1 = arith.constant 0 : i32
    return %c0_i32, %c0_i32_0 : i32, i32
  }
  func.func @transform_8(%arg0: i32) -> (i32, i32, i32) {
    %c0_i32 = arith.constant 0 : i32
    %c0_i32_0 = arith.constant 0 : i32
    %c0_i32_1 = arith.constant 0 : i32
    return %arg0, %c0_i32, %c0_i32_0 : i32, i32, i32
  }
  func.func @transform_9(%arg0: i32) -> (i32, i32) {
    %c0_i32 = arith.constant 0 : i32
    %c0_i32_0 = arith.constant 0 : i32
    %c0_i32_1 = arith.constant 0 : i32
    return %c0_i32, %c0_i32_0 : i32, i32
  }
}

</mosaic_0001>

<bundles_post_ra>
// kernel: tpu_custom_call.1
= control target key start
LH: loop header
LB: loop body
LE: loop exit
PB: predicated region body
PF: predicated region fallthrough
CT: control target
= control target key end

     0   :  { %15 = vsyncpa [#allocation3], 0  ;;  %s1080_s0 = inlined_call_operand.vmem [shape: bf16[1,8,256], index: 0, kind: input, shape index: {}]   ;;  %s1081_s1 = inlined_call_operand.hbm [shape: f32[8,128], index: 1, kind: input, shape index: {}, may-alias: {1,9}]   ;;  %s1082_s2 = inlined_call_operand.hbm [shape: bf16[256,128], index: 2, kind: input, shape index: {}]   ;;  %s1083_s3 = inlined_call_operand.hbm [shape: bf16[128,128], index: 3, kind: input, shape index: {}]   ;;  %s1084_s4 = inlined_call_operand.vmem [shape: f32[1,128], index: 4, kind: input, shape index: {}]   ;;  %s1085_s5 = inlined_call_operand.vmem [shape: f32[1,128], index: 5, kind: input, shape index: {}]   ;;  %s1086_s6 = inlined_call_operand.hbm [shape: bf16[128,128], index: 6, kind: input, shape index: {}]   ;;  %s1087_s7 = inlined_call_operand.vmem [shape: f32[1,128], index: 7, kind: input, shape index: {}]   ;;  %s1088_s8 = inlined_call_operand.hbm [shape: f32[1,8,128], index: 8, kind: output, shape index: {0}]   ;;  %s1089_s9 = inlined_call_operand.hbm [shape: f32[8,128], index: 9, kind: output, shape index: {1}, may-alias: {1,9}]  }
   0x1   :  { %16 = vsyncpa [#allocation6], 0 }
   0x2   :  { %17 = vsyncpa [#allocation9], 0 }
   0x3   :  { %18 = vsyncpa [#allocation4], 0 }
   0x4   :  { %19 = vsyncpa [#allocation12], 0  ;;  %s897_s30 = smov [#allocation5]   ;;  %s755_s13 = scalar_lea.hbm %s1082_s2, 2048 }
   0x5   :  { %s37_s10 = sshll.u32 %s897_s30, 4  ;;  %p756_p0 = scmp.ne.s32.totalorder %s1082_s2, %s755_s13  ;;  %s38_s10 = int_to_ptr.vmem [resolvable:$true] %s37_s10 }
   0x6   :  { %p759_p1 = scmp.lt.u32.totalorder %s755_s13, %s1082_s2 }
   0x8   :  { %p761_p2 = pnand %p759_p1, %p756_p0 }
   0xa   :  { %764 = shalt.err (!%p761_p2)
}
   0xb   :  { %s765_s18 = scalar_lea.vmem %s38_s10, 2048  ;;  %p770_p4 = scmp.lt.s32.totalorder %s38_s10, %s38_s10 }
   0xc   :  { %p766_p3 = scmp.ne.s32.totalorder %s38_s10, %s765_s18  ;;  %p771_p5 = scmp.lt.s32.totalorder %s765_s18, %s765_s18 }
   0xe   :  { %p772_p6 = por %p771_p5, %p770_p4 }
  0x10   :  { %p773_p7 = pnand %p772_p6, %p766_p3 }
  0x12   :  { %776 = shalt.err (!%p773_p7)
}
  0x13   :  { %s898_s19 = smov 64   ;;  %s899_s20 = smov 4  }
  0x14   :  { %43 = dma.hbm_to_vmem [thread:$0]  %s1082_s2, 2048, %s38_s10, [#allocation6], %s898_s19, %s898_s19, %s899_s20  }
  0x15   :  { %s900_s23 = smov [#allocation2]   ;;  %s901_s25 = smov [#allocation7]  }
  0x16   :  { %s28_s24 = sshll.u32 %s900_s23, 4  ;;  %s49_s26 = sshll.u32 %s901_s25, 4  ;;  %s29_s24 = int_to_ptr.vmem [resolvable:$true] %s28_s24  ;;  %s50_s26 = int_to_ptr.vmem [resolvable:$true] %s49_s26 }
  0x17   :  { %s777_s29 = scalar_lea.hbm %s1081_s1, 128 }
  0x18   :  { %p778_p8 = scmp.ne.s32.totalorder %s1081_s1, %s777_s29  ;;  %p781_p9 = scmp.lt.u32.totalorder %s777_s29, %s1081_s1 }
  0x1a   :  { %p783_p10 = pnand %p781_p9, %p778_p8 }
  0x1c   :  { %786 = shalt.err (!%p783_p10)
}
  0x1d   :  { %s787_s2 = scalar_lea.vmem %s29_s24, 128  ;;  %p792_p12 = scmp.lt.s32.totalorder %s29_s24, %s29_s24 }
  0x1e   :  { %p788_p11 = scmp.ne.s32.totalorder %s29_s24, %s787_s2  ;;  %p793_p13 = scmp.lt.s32.totalorder %s787_s2, %s787_s2 }
  0x20   :  { %p794_p0 = por %p793_p13, %p792_p12 }
  0x22   :  { %p795_p1 = pnand %p794_p0, %p788_p11 }
  0x24   :  { %798 = shalt.err (!%p795_p1)
}
  0x25   :  { %31 = dma.hbm_to_vmem [thread:$0]  %s1081_s1, 128, %s29_s24, [#allocation3]  }
  0x26   :  { %s799_s17 = scalar_lea.hbm %s1083_s3, 1024 }
  0x27   :  { %p800_p2 = scmp.ne.s32.totalorder %s1083_s3, %s799_s17  ;;  %p803_p3 = scmp.lt.u32.totalorder %s799_s17, %s1083_s3 }
  0x29   :  { %p805_p4 = pnand %p803_p3, %p800_p2 }
  0x2b   :  { %808 = shalt.err (!%p805_p4)
}
  0x2c   :  { %s809_s25 = scalar_lea.vmem %s50_s26, 1024  ;;  %p814_p6 = scmp.lt.s32.totalorder %s50_s26, %s50_s26 }
  0x2d   :  { %p810_p5 = scmp.ne.s32.totalorder %s50_s26, %s809_s25  ;;  %p815_p7 = scmp.lt.s32.totalorder %s809_s25, %s809_s25 }
  0x2f   :  { %p816_p8 = por %p815_p7, %p814_p6 }
  0x31   :  { %p817_p9 = pnand %p816_p8, %p810_p5 }
  0x33   :  { %820 = shalt.err (!%p817_p9)
}
  0x34   :  { %55 = dma.hbm_to_vmem [thread:$0]  %s1083_s3, 1024, %s50_s26, [#allocation6], %s898_s19, %s898_s19, %s899_s20  }
  0x35   :  { %s902_s27 = smov [#allocation8]   ;;  %s821_s11 = scalar_lea.hbm %s1086_s6, 1024 }
  0x36   :  { %s65_s28 = sshll.u32 %s902_s27, 4  ;;  %p822_p10 = scmp.ne.s32.totalorder %s1086_s6, %s821_s11  ;;  %s66_s28 = int_to_ptr.vmem [resolvable:$true] %s65_s28 }
  0x37   :  { %p825_p11 = scmp.lt.u32.totalorder %s821_s11, %s1086_s6 }
  0x39   :  { %p827_p12 = pnand %p825_p11, %p822_p10 }
  0x3b   :  { %830 = shalt.err (!%p827_p12)
}
  0x3c   :  { %s831_s14 = scalar_lea.vmem %s66_s28, 1024  ;;  %p836_p0 = scmp.lt.s32.totalorder %s66_s28, %s66_s28 }
  0x3d   :  { %p832_p13 = scmp.ne.s32.totalorder %s66_s28, %s831_s14  ;;  %p837_p1 = scmp.lt.s32.totalorder %s831_s14, %s831_s14 }
  0x3f   :  { %p838_p2 = por %p837_p1, %p836_p0 }
  0x41   :  { %p839_p3 = pnand %p838_p2, %p832_p13 }
  0x43   :  { %842 = shalt.err (!%p839_p3)
}
  0x44   :  { %71 = dma.hbm_to_vmem [thread:$0]  %s1086_s6, 1024, %s66_s28, [#allocation9], %s898_s19, %s898_s19, %s899_s20  }
  0x45   :  { %887 = dma.done.wait [#allocation3], 128  }
  0x46   :  { %888 = vsyncadd [#allocation3], 4294967168 }
  0x47   :  { %889 = dma.done.wait [#allocation6], 3072  }
  0x48   :  { %890 = vsyncadd [#allocation6], 4294964224 }
  0x49   :  { %891 = dma.done.wait [#allocation9], 1024  }
  0x4a   :  { %892 = vsyncadd [#allocation9], 4294966272  ;;  %v903_v0 = vmov 0.0   ;;  %vm904_vm0 = vmmov 0   ;;  %v711_v1 = vld [vmem:[#allocation5 + $0x40] sm:$0xff]   ;;  %v714_v4 = vld [vmem:[#allocation5 + $0x48] sm:$0xff]  }
  0x4b   :  { %659 = vmatprep.subr.bf16.mxu1 %v903_v0  ;;  %675 = vmatprep.mubr.msk.bf16.mxu1 %vm904_vm0, %v903_v0  ;;  %v712_v2 = vld [vmem:[#allocation7] sm:$0xff]   ;;  %v715_v5 = vld [vmem:[#allocation7 + $0x8] sm:$0xff]   ;;  %v717_v7 = vld [vmem:[#allocation5 + $0x50] sm:$0xff]   ;;  %vm423_vm1 = vcmask 261120   ;;  %s907_s21 = smov [#allocation11]  }
  0x4c   :  { %619 = vmatprep.subr.bf16.mxu0 %v711_v1  ;;  %v713_v3 = vld [vmem:[#allocation5] sm:$0xff]   ;;  %660 = vmatpush3.bf16.msra.mxu1 %v712_v2  ;;  %v716_v6 = vld [vmem:[#allocation5 + $0x8] sm:$0xff]   ;;  %v718_v8 = vld [vmem:[#allocation7 + $0x10] sm:$0xff]   ;;  %s566_s22 = sshll.u32 %s907_s21, 4  ;;  %s567_s22 = int_to_ptr.vmem [resolvable:$true] %s566_s22 }
  0x4d   :  { %620 = vmatpush3.bf16.msra.mxu0 %v713_v3  ;;  %661 = vmatprep.subr.bf16.mxu1 %v903_v0  ;;  %v719_v9 = vld [vmem:[#allocation5 + $0x10] sm:$0xff]   ;;  %v720_v10 = vld [vmem:[#allocation5 + $0x58] sm:$0xff]   ;;  %v723_v13 = vld [vmem:[#allocation5 + $0x60] sm:$0xff]   ;;  %s843_s23 = scalar_lea.vmem %s567_s22, 128  ;;  %p848_p5 = scmp.lt.s32.totalorder %s567_s22, %s567_s22 }
  0x4e   :  { %621 = vmatprep.subr.bf16.mxu0 %v714_v4  ;;  %v721_v11 = vld [vmem:[#allocation7 + $0x18] sm:$0xff]   ;;  %v724_v14 = vld [vmem:[#allocation7 + $0x20] sm:$0xff]   ;;  %v726_v16 = vld [vmem:[#allocation5 + $0x68] sm:$0xff]   ;;  %p844_p4 = scmp.ne.s32.totalorder %s567_s22, %s843_s23  ;;  %p849_p6 = scmp.lt.s32.totalorder %s843_s23, %s843_s23 }
  0x4f   :  { %v722_v12 = vld [vmem:[#allocation5 + $0x18] sm:$0xff]   ;;  %v725_v15 = vld [vmem:[#allocation5 + $0x20] sm:$0xff]   ;;  %v727_v17 = vld [vmem:[#allocation7 + $0x28] sm:$0xff]  }
  0x50   :  { %662 = vmatpush3.bf16.msra.mxu1 %v715_v5  ;;  %v728_v18 = vld [vmem:[#allocation5 + $0x28] sm:$0xff]   ;;  %v729_v19 = vld [vmem:[#allocation5 + $0x70] sm:$0xff]   ;;  %v732_v22 = vld [vmem:[#allocation5 + $0x78] sm:$0xff]   ;;  %p850_p7 = por %p849_p6, %p848_p5 }
  0x51   :  { %622 = vmatpush3.bf16.msra.mxu0 %v716_v6  ;;  %663 = vmatprep.subr.bf16.mxu1 %v903_v0  ;;  %v730_v20 = vld [vmem:[#allocation7 + $0x30] sm:$0xff]   ;;  %v94_v23 = vld [vmem:[%s1080_s0] sm:$0xff]  ;;  %v737_v52 = vld [vmem:[#allocation8] sm:$0xff]  }
  0x52   :  { %623 = vmatprep.subr.bf16.mxu0 %v717_v7  ;;  %v731_v21 = vld [vmem:[#allocation5 + $0x30] sm:$0xff]   ;;  %v733_v24 = vld [vmem:[#allocation7 + $0x38] sm:$0xff]   ;;  %v583_v25 = vcombine.high %v94_v23, %v94_v23  ;;  %v582_v29 = vcombine.low %v94_v23, %v94_v23  ;;  %v738_v53 = vld [vmem:[#allocation8 + $0x8] sm:$0xff]   ;;  %p851_p8 = pnand %p850_p7, %p844_p4 }
  0x53   :  { %v1028_v26 = vld [vmem:[#allocation2] sm:$0xff]  ;;  %v739_v55 = vld [vmem:[#allocation8 + $0x10] sm:$0xff]   ;;  %v741_v57 = vld [vmem:[#allocation8 + $0x20] sm:$0xff]  }
  0x54   :  { %664 = vmatpush3.bf16.msra.mxu1 %v718_v8  ;;  %v734_v27 = vld [vmem:[#allocation5 + $0x38] sm:$0xff]   ;;  %269 = vmatprep.mubr.bf16.mxu0 %v583_v25  ;;  %v277_v28 = vpack.c.bf16 %v1028_v26, %v1028_v26  ;;  %v742_v58 = vld [vmem:[#allocation8 + $0x28] sm:$0xff]   ;;  %v743_v59 = vld [vmem:[#allocation8 + $0x30] sm:$0xff]  }
  0x55   :  { %624 = vmatpush3.bf16.msra.mxu0 %v719_v9  ;;  %665 = vmatprep.subr.bf16.mxu1 %v903_v0  ;;  %v600_v30 = vld [vmem:[%s1085_s5] ss:$0 sm:$0xff]  ;;  %s906_s5 = smov 32  }
  0x56   :  { %625 = vmatprep.subr.bf16.mxu0 %v720_v10  ;;  %v581_v41 = vld [vmem:[%s1084_s4] ss:$0 sm:$0xff]  ;;  %s905_s4 = smov 96  }
  0x57   :  { %v740_v56 = vld [vmem:[#allocation8 + $0x18] sm:$0xff]  }
  0x58   :  { %666 = vmatpush3.bf16.msra.mxu1 %v721_v11  ;;  %v744_v60 = vld [vmem:[#allocation8 + $0x38] sm:$0xff]  }
  0x59   :  { %626 = vmatpush3.bf16.msra.mxu0 %v722_v12  ;;  %667 = vmatprep.subr.bf16.mxu1 %v903_v0 }
  0x5a   :  { %627 = vmatprep.subr.bf16.mxu0 %v723_v13 }
  0x5c   :  { %668 = vmatpush3.bf16.msra.mxu1 %v724_v14 }
  0x5d   :  { %628 = vmatpush3.bf16.msra.mxu0 %v725_v15  ;;  %669 = vmatprep.subr.bf16.mxu1 %v903_v0 }
  0x5e   :  { %629 = vmatprep.subr.bf16.mxu0 %v726_v16 }
  0x60   :  { %670 = vmatpush3.bf16.msra.mxu1 %v727_v17 }
  0x61   :  { %630 = vmatpush3.bf16.msra.mxu0 %v728_v18  ;;  %671 = vmatprep.subr.bf16.mxu1 %v903_v0 }
  0x62   :  { %631 = vmatprep.subr.bf16.mxu0 %v729_v19 }
  0x64   :  { %672 = vmatpush3.bf16.msra.mxu1 %v730_v20 }
  0x65   :  { %632 = vmatpush3.bf16.msra.mxu0 %v731_v21  ;;  %673 = vmatprep.subr.bf16.mxu1 %v903_v0 }
  0x66   :  { %633 = vmatprep.subr.bf16.mxu0 %v732_v22 }
  0x68   :  { %674 = vmatpush3.bf16.msra.mxu1 %v733_v24 }
  0x69   :  { %634 = vmatpush3.bf16.msra.mxu0 %v734_v27 }
  0x6a   :  { %679 = vmatprep.subr.bf16.mxu0 %v903_v0 }
  0x6b   :  { %676 = vmatmul.mubr.bf16.vlgmr.msra.gmra.mrb[0].mxu1 %v277_v28 }
  0x6c   :  { %270 = vmatmul.mubr.bf16.vlgmr.msra.gmra.mrb[0].mxu0 %v582_v29 }
  0x6d   :  { %695 = vmatprep.mubr.msk.bf16.mxu0 %vm904_vm0, %v903_v0  ;;  %680 = vmatpush3.bf16.msra.mxu0 %v737_v52 }
  0x6e   :  { %681 = vmatprep.subr.bf16.mxu0 %v903_v0 }
  0x71   :  { %682 = vmatpush3.bf16.msra.mxu0 %v738_v53 }
  0x72   :  { %683 = vmatprep.subr.bf16.mxu0 %v903_v0 }
  0x75   :  { %684 = vmatpush3.bf16.msra.mxu0 %v739_v55 }
  0x76   :  { %685 = vmatprep.subr.bf16.mxu0 %v903_v0 }
  0x79   :  { %686 = vmatpush3.bf16.msra.mxu0 %v740_v56 }
  0x7a   :  { %687 = vmatprep.subr.bf16.mxu0 %v903_v0 }
  0x7d   :  { %688 = vmatpush3.bf16.msra.mxu0 %v741_v57 }
  0x7e   :  { %689 = vmatprep.subr.bf16.mxu0 %v903_v0 }
  0x81   :  { %690 = vmatpush3.bf16.msra.mxu0 %v742_v58 }
  0x82   :  { %691 = vmatprep.subr.bf16.mxu0 %v903_v0 }
  0x85   :  { %692 = vmatpush3.bf16.msra.mxu0 %v743_v59 }
  0x86   :  { %693 = vmatprep.subr.bf16.mxu0 %v903_v0  ;;  %v610_v0 = vld [vmem:[%s1087_s7] ss:$0 sm:$0xff] }
  0x89   :  { %694 = vmatpush3.bf16.msra.mxu0 %v744_v60 }
 0x13e   :  { %v383_v31 = vpop.f32.mrb[0].mxu1 }
 0x13f   :  { %v384_v32 = vadd.f32 %v600_v30, %v383_v31  ;;  %v635_v33 = vpop.f32.mrb[0].mxu0  ;;  %v677_v34 = vpop.f32.mrb[1].mxu1 }
 0x140   :  { %v636_v35 = vpop.f32.mrb[1].mxu0  ;;  %v386_v36 = vpop.f32.mrb[2].mxu1 }
 0x141   :  { %v637_v37 = vadd.f32 %v636_v35, %v635_v33  ;;  %397 = vrot.lane.b32.xlu0 %v384_v32, %s898_s19  ;;  %v678_v38 = vpop.f32.mrb[3].mxu1  ;;  %v638_v39 = vpop.f32.mrb[2].mxu0 }
 0x142   :  { %v639_v40 = vpop.f32.mrb[3].mxu0 }
 0x143   :  { %v272_v42 = vadd.f32 %v637_v37, %v581_v41 }
 0x145   :  { %v389_v43 = vadd.f32 %v384_v32, %v272_v42 }
 0x147   :  { %v609_v44 = vmul.f32 -1.442695, %v389_v43 }
 0x149   :  { %745 = vpow2.f32 %v609_v44 }
 0x153   :  { %v746_v45 = vpop.eup %745 }
 0x154   :  { %v393_v46 = vadd.f32 1.0, %v746_v45 }
 0x156   :  { %747 = vrcp.f32 %v393_v46 }
 0x160   :  { %v748_v47 = vpop.eup %747 }
 0x161   :  { %v407_v62 = vsub.f32 1.0, %v748_v47 }
 0x1b3   :  { %v398_v48 = vpop.permute.xlu0 %397 }
 0x1b4   :  { %v400_v49 = vmul.f32 %v748_v47, %v398_v48 }
 0x1b6   :  { %402 = vrot.lane.b32.xlu0 %v400_v49, %s898_s19 }
 0x228   :  { %v403_v50 = vpop.permute.xlu0 %402 }
 0x229   :  { %v405_v51 = vadd.f32 %v403_v50, %v272_v42 }
 0x22b   :  { %749 = vtanh.f32 %v405_v51 }
 0x235   :  { %v750_v54 = vpop.eup %749 }
 0x236   :  { %409 = vrot.lane.b32.xlu1 %v750_v54, %s905_s4 }
 0x23a   :  { %414 = vrot.lane.b32.xlu1 %v1028_v26, %s906_s5 }
 0x2a8   :  { %v410_v61 = vpop.permute.xlu1 %409 }
 0x2a9   :  { %v412_v1 = vmul.f32 %v410_v61, %v407_v62 }
 0x2ac   :  { %v415_v63 = vpop.permute.xlu1 %414 }
 0x2ad   :  { %v417_v2 = vmul.f32 %v748_v47, %v415_v63 }
 0x2af   :  { %v418_v3 = vadd.f32 %v417_v2, %v412_v1 }
 0x2b1   :  { %420 = vrot.lane.b32.xlu0 %v418_v3, %s905_s4 }
 0x323   :  { %v421_v4 = vpop.permute.xlu0 %420 }
 0x324   :  { %v424_v5 = vsel %vm423_vm1, %v421_v4, %v1028_v26 }
 0x325   :  { %v426_v6 = vpack.c.bf16 %v424_v5, %v424_v5  ;;  %425 = vst [vmem:[#allocation11] sm:$0xff] %v424_v5 }
 0x327   :  { %696 = vmatmul.mubr.bf16.vlgmr.msra.gmra.mrb[4].mxu0 %v426_v6 }
 0x3fa   :  { %v532_v7 = vpop.f32.mrb[4].mxu0 }
 0x3fb   :  { %v533_v8 = vadd.f32 %v610_v0, %v532_v7  ;;  %v697_v9 = vpop.f32.mrb[5].mxu0 }
 0x3fc   :  { %v535_v10 = vpop.f32.mrb[6].mxu0 }
 0x3fd   :  { %538 = vmax.xlane.f32.xlu1 %v533_v8  ;;  %v698_v11 = vpop.f32.mrb[7].mxu0 }
 0x48a   :  { %v539_v12 = vpop.xlane.xlu1 %538 }
 0x48b   :  { %v540_v13 = vsub.f32 %v533_v8, %v539_v12 }
 0x48d   :  { %v541_v14 = vmul.f32 1.442695, %v540_v13 }
 0x48f   :  { %751 = vpow2.f32 %v541_v14 }
 0x499   :  { %v752_v15 = vpop.eup %751 }
 0x49a   :  { %543 = vadd.xlane.f32.xlu0 %v752_v15 }
 0x49b   :  { %854 = shalt.err (!%p851_p8)
}
 0x49c   :  { %s855_s1 = scalar_lea.hbm %s1089_s9, 128 }
 0x49d   :  { %p856_p9 = scmp.ne.s32.totalorder %s1089_s9, %s855_s1  ;;  %p859_p10 = scmp.lt.u32.totalorder %s855_s1, %s1089_s9 }
 0x49f   :  { %p861_p11 = pnand %p859_p10, %p856_p9 }
 0x4a1   :  { %864 = shalt.err (!%p861_p11)
}
 0x4a2   :  { %569 = dma.vmem_to_hbm [thread:$0]  %s567_s22, 128, %s1089_s9, [#allocation12]  }
 0x4a3   :  { %s908_s12 = smov [#allocation10]  }
 0x4a4   :  { %s556_s13 = sshll.u32 %s908_s12, 4  ;;  %s557_s13 = int_to_ptr.vmem [resolvable:$true] %s556_s13 }
 0x4a5   :  { %s865_s2 = scalar_lea.vmem %s557_s13, 128  ;;  %p870_p13 = scmp.lt.s32.totalorder %s557_s13, %s557_s13 }
 0x4a6   :  { %p866_p12 = scmp.ne.s32.totalorder %s557_s13, %s865_s2  ;;  %p871_p0 = scmp.lt.s32.totalorder %s865_s2, %s865_s2 }
 0x4a8   :  { %p872_p1 = por %p871_p0, %p870_p13 }
 0x4aa   :  { %p873_p2 = pnand %p872_p1, %p866_p12 }
 0x527   :  { %v544_v16 = vpop.xlane.xlu0 %543 }
 0x528   :  { %753 = vlog2.f32 %v544_v16 }
 0x532   :  { %v754_v17 = vpop.eup %753 }
 0x533   :  { %v546_v18 = vmul.f32 0.6931472, %v754_v17 }
 0x535   :  { %v547_v19 = vadd.f32 %v546_v18, %v539_v12 }
 0x537   :  { %v548_v20 = vsub.f32 %v533_v8, %v547_v19 }
 0x539   :  { %549 = vst [vmem:[#allocation10] sm:$0xff] %v548_v20 }
 0x53a   :  { %876 = shalt.err (!%p873_p2)
}
 0x53b   :  { %s877_s9 = scalar_lea.hbm %s1088_s8, 128 }
 0x53c   :  { %p878_p3 = scmp.ne.s32.totalorder %s1088_s8, %s877_s9  ;;  %p881_p4 = scmp.lt.u32.totalorder %s877_s9, %s1088_s8 }
 0x53e   :  { %p883_p5 = pnand %p881_p4, %p878_p3 }
 0x540   :  { %886 = shalt.err (!%p883_p5)
}
 0x541   :  { %559 = dma.vmem_to_hbm [thread:$0]  %s557_s13, 128, %s1088_s8, [#allocation4]  }
 0x542   :  { %893 = dma.done.wait [#allocation4], 128  }
 0x543   :  { %894 = vsyncadd [#allocation4], 4294967168 }
 0x544   :  { %895 = dma.done.wait [#allocation12], 128  }
 0x545   :  { %896 = vsyncadd [#allocation12], 4294967168 }
 0x546   :  { %576 = vsyncpa [#allocation3], 1 }
 0x547   :  { %577 = vsyncpa [#allocation6], 1 }
 0x548   :  { %578 = vsyncpa [#allocation9], 1 }
 0x549   :  { %579 = vsyncpa [#allocation4], 1 }
 0x54a   :  { %580 = vsyncpa [#allocation12], 1 }

</bundles_post_ra>
